<compile_context>
chip_gen: v7x
topology: tpu7x:2x2x1
jax: 0.10.0
libtpu: 0.0.40
codegen_flags: <defaults>
</compile_context>

<pallas_src>
import jax
import jax.numpy as jnp
import numpy as np
from jax.experimental import pallas as pl
from jax.experimental.pallas import tpu as pltpu

# ----------------------- small config -----------------------
B = 2          # batch
IN_C = 3       # RGB input
IMG = 16       # input spatial
C_LAST = 16    # channels of last_conv (512 in real VGG16)
HS = WS = 2    # spatial after features_1 maxpool (7 in real VGG16)
POOL_OUT = 2   # AdaptiveAvgPool2d target (7 in real VGG16) -> identity here
S_SPATIAL = HS * WS
F_FLAT = C_LAST * S_SPATIAL
H1 = 32        # classifier hidden width (4096 in real VGG16)
NC = 10        # number of classes (1000 in real VGG16)
NC_PAD = 128   # lane-dense padded class dim (1024 at real scale)

assert POOL_OUT == HS == WS, "AdaptiveAvgPool2d is identity (7x7 -> 7x7 in real VGG16)"


# ----------------------- Pallas kernel -----------------------
def ablate_classifier_kernel(flat_r_ref, w1_r_ref, b1_ref, w2_ref, b2_ref,
                             w3_ref, b3_ref, pen_ref, fc_ref, corr_ref):
    s = pl.program_id(0)

    @pl.when(s == 0)
    def _():
        corr_ref[...] = jnp.zeros_like(corr_ref)

    # Layer-1 linearity, streamed over the K (spatial) grid axis:
    #   corr[c, :] += flat[c, s] * w1[(c, s), :]        (f32 accumulation, bf16 w1 stream)
    corr_ref[...] += flat_r_ref[0] * w1_r_ref[0].astype(jnp.float32)

    @pl.when(s == pl.num_programs(0) - 1)
    def _():
        corr = corr_ref[...]                                    # (C_LAST, H1) f32
        base = jnp.sum(corr, axis=0, keepdims=True)             # (1, H1) == flat @ w1

        # classifier_0: Linear -> ReLU -> Dropout(eval) -> Linear -> ReLU -> Dropout(eval)
        # Row c is the channel-c ablated hidden state.
        h = jnp.maximum(base - corr + b1_ref[...], 0.0)         # (C_LAST, H1)
        h2 = jnp.dot(h.astype(jnp.bfloat16), w2_ref[...],
                     preferred_element_type=jnp.float32) + b2_ref[...]
        penult = jnp.maximum(h2, 0.0)

        # classifier_1: final Linear (N padded to 128 lanes -> lane-dense slab store)
        logits = jnp.dot(penult.astype(jnp.bfloat16), w3_ref[...],
                         preferred_element_type=jnp.float32) + b3_ref[...]

        pen_ref[...] = penult
        fc_ref[...] = logits


def vgg16_remove1_ablation(last_conv, p):
    """last_conv: (B, C_LAST, H, W) NCHW output of features_0.
    Returns (penultimate_list, last_fc_list) of shapes (C_LAST, H1), (C_LAST, NC)."""
    # features_1: MaxPool2d(2,2) run ONCE (zeroing a channel before the per-channel pool
    # == zeroing its pooled value, since the zeroed channel pools to exactly 0).
    # AdaptiveAvgPool2d((POOL_OUT, POOL_OUT)) is identity here (input == target size).
    pooled0 = maxpool2(last_conv)[0]                            # (C_LAST, HS, WS); batch row 0
    flat = pooled0.reshape(C_LAST, S_SPATIAL)                   # torch.flatten(.,1) (c,h,w) order
    flat_r = flat.T.reshape(S_SPATIAL, C_LAST, 1)               # (S, C_LAST, 1) f32

    # w1 rows regrouped so slice s holds spatial position s for every channel:
    #   w1_r[s, c, :] = w1[c*S_SPATIAL + s, :]   (one-time wrapper permute; bf16 stream)
    w1_r = p['w1'].reshape(C_LAST, S_SPATIAL, H1).transpose(1, 0, 2).astype(jnp.bfloat16)
    w2 = p['w2'].astype(jnp.bfloat16)
    # Final Linear padded to a lane-dense 128-wide N (NC=10 -> 128; 1000 -> 1024 at scale).
    w3p = jnp.zeros((H1, NC_PAD), jnp.float32).at[:, :NC].set(p['w3']).astype(jnp.bfloat16)
    b3p = jnp.zeros((1, NC_PAD), jnp.float32).at[:, :NC].set(p['b3'])

    penult, fc_pad = pl.pallas_call(
        ablate_classifier_kernel,
        out_shape=(jax.ShapeDtypeStruct((C_LAST, H1), jnp.float32),
                   jax.ShapeDtypeStruct((C_LAST, NC_PAD), jnp.float32)),
        grid_spec=pltpu.PrefetchScalarGridSpec(
            num_scalar_prefetch=0,
            grid=(S_SPATIAL,),
            in_specs=[
                pl.BlockSpec((1, C_LAST, 1), lambda s: (s, 0, 0)),    # flat_r  (K-stream)
                pl.BlockSpec((1, C_LAST, H1), lambda s: (s, 0, 0)),   # w1_r    (K-stream)
                pl.BlockSpec((1, H1), lambda s: (0, 0)),              # b1
                pl.BlockSpec((H1, H1), lambda s: (0, 0)),             # w2 (resident)
                pl.BlockSpec((1, H1), lambda s: (0, 0)),              # b2
                pl.BlockSpec((H1, NC_PAD), lambda s: (0, 0)),         # w3 (padded, resident)
                pl.BlockSpec((1, NC_PAD), lambda s: (0, 0)),          # b3 (padded)
            ],
            out_specs=(pl.BlockSpec((C_LAST, H1), lambda s: (0, 0)),
                       pl.BlockSpec((C_LAST, NC_PAD), lambda s: (0, 0))),
            scratch_shapes=[pltpu.VMEM((C_LAST, H1), jnp.float32)],   # f32 corr accumulator
        ),
        compiler_params=pltpu.CompilerParams(dimension_semantics=("arbitrary",)),
    )(flat_r, w1_r, p['b1'], w2, p['b2'], w3p, b3p)
    return penult, fc_pad[:, :NC]


# ----------------------- plain-JAX glue (features_0, runs once) -----------------------
def conv_relu(x, w, b):
    y = jax.lax.conv_general_dilated(
        x, w, window_strides=(1, 1), padding=((1, 1), (1, 1)),
        dimension_numbers=('NCHW', 'OIHW', 'NCHW'))
    return jax.nn.relu(y + b[None, :, None, None])


def maxpool2(x):  # MaxPool2d(2, 2) on NCHW
    return jax.lax.reduce_window(x, -jnp.inf, jax.lax.max,
                                 (1, 1, 2, 2), (1, 1, 2, 2), 'VALID')


def features_0(x, p):
    x = conv_relu(x, p['c1w'], p['c1b'])
    x = conv_relu(x, p['c2w'], p['c2b'])
    x = maxpool2(x)                               # 16 -> 8
    x = conv_relu(x, p['c3w'], p['c3b'])
    x = conv_relu(x, p['c4w'], p['c4b'])
    x = maxpool2(x)                               # 8 -> 4
    x = conv_relu(x, p['c5w'], p['c5b'])          # last conv block (no pool, like VGG block5)
    return x                                      # (B, C_LAST, 4, 4)


def init_params(key):
    ks = jax.random.split(key, 20)

    def conv_w(k, cout, cin):
        return jax.random.normal(k, (cout, cin, 3, 3), jnp.float32) / np.sqrt(cin * 9)

    def vec(k, n, s=0.01):
        return jax.random.normal(k, (n,), jnp.float32) * s

    def lin_w(k, fin, fout):
        return jax.random.normal(k, (fin, fout), jnp.float32) / np.sqrt(fin)

    return dict(
        c1w=conv_w(ks[0], 8, IN_C),     c1b=vec(ks[1], 8),
        c2w=conv_w(ks[2], 8, 8),        c2b=vec(ks[3], 8),
        c3w=conv_w(ks[4], C_LAST, 8),   c3b=vec(ks[5], C_LAST),
        c4w=conv_w(ks[6], C_LAST, C_LAST), c4b=vec(ks[7], C_LAST),
        c5w=conv_w(ks[8], C_LAST, C_LAST), c5b=vec(ks[9], C_LAST),
        w1=lin_w(ks[10], F_FLAT, H1), b1=vec(ks[11], H1).reshape(1, H1),
        w2=lin_w(ks[12], H1, H1),     b2=vec(ks[13], H1).reshape(1, H1),
        w3=lin_w(ks[14], H1, NC),     b3=vec(ks[15], NC).reshape(1, NC),
    )


# ----------------------- pure-JAX reference (literal PyTorch semantics, f32) -----------------------
def reference(last_conv, p):
    pens, fcs = [], []
    for idx in range(C_LAST):
        lc = last_conv.at[:, idx, :, :].set(0.0)            # zero channel idx
        mp = maxpool2(lc)                                    # features_1
        ap = mp                                              # AdaptiveAvgPool2d identity
        flat = ap.reshape(B, -1)                             # torch.flatten(..., 1)
        h = jax.nn.relu(flat @ p['w1'] + p['b1'])
        pen = jax.nn.relu(h @ p['w2'] + p['b2'])
        fc = pen @ p['w3'] + p['b3']
        pens.append(pen[0])
        fcs.append(fc[0])
    return jnp.stack(pens), jnp.stack(fcs)


# ----------------------- main -----------------------
if __name__ == "__main__":
    key = jax.random.PRNGKey(0)
    k_in, k_p = jax.random.split(key)
    x = jax.random.normal(k_in, (B, IN_C, IMG, IMG), jnp.float32)
    p = init_params(k_p)

    last_conv = features_0(x, p)  # (B, C_LAST, 4, 4)

    run = jax.jit(vgg16_remove1_ablation)
    penultimate_list, last_fc_list = run(last_conv, p)
    jax.block_until_ready((penultimate_list, last_fc_list))

    assert penultimate_list.shape == (C_LAST, H1)
    assert last_fc_list.shape == (C_LAST, NC)

    # Tolerance accounts for bf16 weights (f32 accumulation) vs the pure-f32 reference.
    ref_pen, ref_fc = reference(last_conv, p)
    np.testing.assert_allclose(np.asarray(penultimate_list), np.asarray(ref_pen),
                               rtol=5e-2, atol=5e-2)
    np.testing.assert_allclose(np.asarray(last_fc_list), np.asarray(ref_fc),
                               rtol=5e-2, atol=5e-2)

    print("KERNEL_OK")
</pallas_src>

<mosaic_0001>
module attributes {stable_mosaic.version = 11 : i64} {
  func.func @ablate_classifier_kernel(%arg0: i32, %arg1: memref<1x16x1xf32, #tpu.memory_space<vmem>>, %arg2: memref<1x16x32xbf16, #tpu.memory_space<vmem>>, %arg3: memref<1x32xf32, #tpu.memory_space<vmem>>, %arg4: memref<32x32xbf16, #tpu.memory_space<vmem>>, %arg5: memref<1x32xf32, #tpu.memory_space<vmem>>, %arg6: memref<32x128xbf16, #tpu.memory_space<vmem>>, %arg7: memref<1x128xf32, #tpu.memory_space<vmem>>, %arg8: memref<16x32xf32, #tpu.memory_space<vmem>>, %arg9: memref<16x128xf32, #tpu.memory_space<vmem>>, %arg10: memref<16x32xf32, #tpu.memory_space<vmem>>) attributes {dimension_semantics = [#tpu.dimension_semantics<arbitrary>], iteration_bounds = array<i64: 4>, scalar_prefetch = 0 : i64, scratch_operands = 1 : i64, tpu.core_type = #tpu.core_type<tc>, window_params = [{transform_indices = @transform_0, window_bounds = array<i64: 1, 16, 1>}, {transform_indices = @transform_1, window_bounds = array<i64: 1, 16, 32>}, {pipeline_mode = #tpu.pipeline_mode<synchronous>, transform_indices = @transform_2, window_bounds = array<i64: 1, 32>}, {pipeline_mode = #tpu.pipeline_mode<synchronous>, transform_indices = @transform_3, window_bounds = array<i64: 32, 32>}, {pipeline_mode = #tpu.pipeline_mode<synchronous>, transform_indices = @transform_4, window_bounds = array<i64: 1, 32>}, {pipeline_mode = #tpu.pipeline_mode<synchronous>, transform_indices = @transform_5, window_bounds = array<i64: 32, 128>}, {pipeline_mode = #tpu.pipeline_mode<synchronous>, transform_indices = @transform_6, window_bounds = array<i64: 1, 128>}, {pipeline_mode = #tpu.pipeline_mode<synchronous>, transform_indices = @transform_7, window_bounds = array<i64: 16, 32>}, {pipeline_mode = #tpu.pipeline_mode<synchronous>, transform_indices = @transform_8, window_bounds = array<i64: 16, 128>}]} {
    %c0_i32 = arith.constant 0 : i32
    %0 = arith.cmpi eq, %arg0, %c0_i32 : i32
    %1 = arith.extui %0 : i1 to i32
    %c0_i32_0 = arith.constant 0 : i32
    %2 = arith.cmpi ne, %1, %c0_i32_0 : i32
    scf.if %2 {
      %cst = arith.constant 0.000000e+00 : f32
      %16 = vector.broadcast %cst : f32 to vector<16x32xf32>
      %c0_11 = arith.constant 0 : index
      %c0_12 = arith.constant 0 : index
      %17 = vector.load %arg10[%c0_11, %c0_12] : memref<16x32xf32, #tpu.memory_space<vmem>>, vector<16x32xf32>
      tpu.vector_store %arg10[%c0_11, %c0_12], %16 {strides = array<i32>} : memref<16x32xf32, #tpu.memory_space<vmem>>, vector<16x32xf32>,
    } else {
    }
    %c0 = arith.constant 0 : index
    %c0_1 = arith.constant 0 : index
    %3 = vector.load %arg10[%c0, %c0_1] : memref<16x32xf32, #tpu.memory_space<vmem>>, vector<16x32xf32>
    %c0_2 = arith.constant 0 : index
    %c0_3 = arith.constant 0 : index
    %c0_4 = arith.constant 0 : index
    %4 = vector.load %arg1[%c0_2, %c0_3, %c0_4] : memref<1x16x1xf32, #tpu.memory_space<vmem>>, vector<1x16x1xf32>
    %5 = vector.shape_cast %4 : vector<1x16x1xf32> to vector<16x1xf32>
    %c0_5 = arith.constant 0 : index
    %c0_6 = arith.constant 0 : index
    %c0_7 = arith.constant 0 : index
    %6 = vector.load %arg2[%c0_5, %c0_6, %c0_7] : memref<1x16x32xbf16, #tpu.memory_space<vmem>>, vector<1x16x32xbf16>
    %7 = vector.shape_cast %6 : vector<1x16x32xbf16> to vector<16x32xbf16>
    %8 = arith.extf %7 : vector<16x32xbf16> to vector<16x32xf32>
    %9 = vector.broadcast %5 : vector<16x1xf32> to vector<16x32xf32>
    %10 = arith.mulf %9, %8 : vector<16x32xf32>
    %11 = arith.addf %3, %10 : vector<16x32xf32>
    %c0_8 = arith.constant 0 : index
    %c0_9 = arith.constant 0 : index
    %12 = vector.load %arg10[%c0_8, %c0_9] : memref<16x32xf32, #tpu.memory_space<vmem>>, vector<16x32xf32>
    tpu.vector_store %arg10[%c0_8, %c0_9], %11 {strides = array<i32>} : memref<16x32xf32, #tpu.memory_space<vmem>>, vector<16x32xf32>,
    %c3_i32 = arith.constant 3 : i32
    %13 = arith.cmpi eq, %arg0, %c3_i32 : i32
    %14 = arith.extui %13 : i1 to i32
    %c0_i32_10 = arith.constant 0 : i32
    %15 = arith.cmpi ne, %14, %c0_i32_10 : i32
    scf.if %15 {
      %c0_11 = arith.constant 0 : index
      %c0_12 = arith.constant 0 : index
      %16 = vector.load %arg10[%c0_11, %c0_12] : memref<16x32xf32, #tpu.memory_space<vmem>>, vector<16x32xf32>
      %cst = arith.constant dense<0.000000e+00> : vector<32xf32>
      %17 = vector.multi_reduction <add>, %16, %cst [0] : vector<16x32xf32> to vector<32xf32>
      %18 = vector.shape_cast %17 : vector<32xf32> to vector<1x32xf32>
      %19 = vector.broadcast %18 : vector<1x32xf32> to vector<16x32xf32>
      %20 = arith.subf %19, %16 : vector<16x32xf32>
      %c0_13 = arith.constant 0 : index
      %c0_14 = arith.constant 0 : index
      %21 = vector.load %arg3[%c0_13, %c0_14] : memref<1x32xf32, #tpu.memory_space<vmem>>, vector<1x32xf32>
      %22 = vector.broadcast %21 : vector<1x32xf32> to vector<16x32xf32>
      %23 = arith.addf %20, %22 : vector<16x32xf32>
      %cst_15 = arith.constant 0.000000e+00 : f32
      %24 = vector.broadcast %cst_15 : f32 to vector<16x32xf32>
      %25 = arith.maximumf %23, %24 : vector<16x32xf32>
      %26 = arith.truncf %25 : vector<16x32xf32> to vector<16x32xbf16>
      %c0_16 = arith.constant 0 : index
      %c0_17 = arith.constant 0 : index
      %27 = vector.load %arg4[%c0_16, %c0_17] : memref<32x32xbf16, #tpu.memory_space<vmem>>, vector<32x32xbf16>
      %cst_18 = arith.constant dense<0.000000e+00> : vector<16x32xf32>
      %28 = tpu.matmul %26, %27, %cst_18 {dimension_numbers = #tpu.dot_dimension_numbers<[1], [0], [0], [1], [0, 0, 1, 1], [], []>} : vector<16x32xbf16>, vector<32x32xbf16>, vector<16x32xf32> -> vector<16x32xf32>
      %c0_19 = arith.constant 0 : index
      %c0_20 = arith.constant 0 : index
      %29 = vector.load %arg5[%c0_19, %c0_20] : memref<1x32xf32, #tpu.memory_space<vmem>>, vector<1x32xf32>
      %30 = vector.broadcast %29 : vector<1x32xf32> to vector<16x32xf32>
      %31 = arith.addf %28, %30 : vector<16x32xf32>
      %cst_21 = arith.constant 0.000000e+00 : f32
      %32 = vector.broadcast %cst_21 : f32 to vector<16x32xf32>
      %33 = arith.maximumf %31, %32 : vector<16x32xf32>
      %34 = arith.truncf %33 : vector<16x32xf32> to vector<16x32xbf16>
      %c0_22 = arith.constant 0 : index
      %c0_23 = arith.constant 0 : index
      %35 = vector.load %arg6[%c0_22, %c0_23] : memref<32x128xbf16, #tpu.memory_space<vmem>>, vector<32x128xbf16>
      %cst_24 = arith.constant dense<0.000000e+00> : vector<16x128xf32>
      %36 = tpu.matmul %34, %35, %cst_24 {dimension_numbers = #tpu.dot_dimension_numbers<[1], [0], [0], [1], [0, 0, 1, 1], [], []>} : vector<16x32xbf16>, vector<32x128xbf16>, vector<16x128xf32> -> vector<16x128xf32>
      %c0_25 = arith.constant 0 : index
      %c0_26 = arith.constant 0 : index
      %37 = vector.load %arg7[%c0_25, %c0_26] : memref<1x128xf32, #tpu.memory_space<vmem>>, vector<1x128xf32>
      %38 = vector.broadcast %37 : vector<1x128xf32> to vector<16x128xf32>
      %39 = arith.addf %36, %38 : vector<16x128xf32>
      %c0_27 = arith.constant 0 : index
      %c0_28 = arith.constant 0 : index
      %40 = vector.load %arg8[%c0_27, %c0_28] : memref<16x32xf32, #tpu.memory_space<vmem>>, vector<16x32xf32>
      tpu.vector_store %arg8[%c0_27, %c0_28], %33 {strides = array<i32>} : memref<16x32xf32, #tpu.memory_space<vmem>>, vector<16x32xf32>,
      %c0_29 = arith.constant 0 : index
      %c0_30 = arith.constant 0 : index
      %41 = vector.load %arg9[%c0_29, %c0_30] : memref<16x128xf32, #tpu.memory_space<vmem>>, vector<16x128xf32>
      tpu.vector_store %arg9[%c0_29, %c0_30], %39 {strides = array<i32>} : memref<16x128xf32, #tpu.memory_space<vmem>>, vector<16x128xf32>,
    } else {
    }
    return
  }
  func.func @transform_0(%arg0: i32) -> (i32, i32, i32) {
    %c0_i32 = arith.constant 0 : i32
    %c0_i32_0 = arith.constant 0 : i32
    %c0_i32_1 = arith.constant 0 : i32
    return %arg0, %c0_i32, %c0_i32_0 : i32, i32, i32
  }
  func.func @transform_1(%arg0: i32) -> (i32, i32, i32) {
    %c0_i32 = arith.constant 0 : i32
    %c0_i32_0 = arith.constant 0 : i32
    %c0_i32_1 = arith.constant 0 : i32
    return %arg0, %c0_i32, %c0_i32_0 : i32, i32, i32
  }
  func.func @transform_2(%arg0: i32) -> (i32, i32) {
    %c0_i32 = arith.constant 0 : i32
    %c0_i32_0 = arith.constant 0 : i32
    %c0_i32_1 = arith.constant 0 : i32
    return %c0_i32, %c0_i32_0 : i32, i32
  }
  func.func @transform_3(%arg0: i32) -> (i32, i32) {
    %c0_i32 = arith.constant 0 : i32
    %c0_i32_0 = arith.constant 0 : i32
    %c0_i32_1 = arith.constant 0 : i32
    return %c0_i32, %c0_i32_0 : i32, i32
  }
  func.func @transform_4(%arg0: i32) -> (i32, i32) {
    %c0_i32 = arith.constant 0 : i32
    %c0_i32_0 = arith.constant 0 : i32
    %c0_i32_1 = arith.constant 0 : i32
    return %c0_i32, %c0_i32_0 : i32, i32
  }
  func.func @transform_5(%arg0: i32) -> (i32, i32) {
    %c0_i32 = arith.constant 0 : i32
    %c0_i32_0 = arith.constant 0 : i32
    %c0_i32_1 = arith.constant 0 : i32
    return %c0_i32, %c0_i32_0 : i32, i32
  }
  func.func @transform_6(%arg0: i32) -> (i32, i32) {
    %c0_i32 = arith.constant 0 : i32
    %c0_i32_0 = arith.constant 0 : i32
    %c0_i32_1 = arith.constant 0 : i32
    return %c0_i32, %c0_i32_0 : i32, i32
  }
  func.func @transform_7(%arg0: i32) -> (i32, i32) {
    %c0_i32 = arith.constant 0 : i32
    %c0_i32_0 = arith.constant 0 : i32
    %c0_i32_1 = arith.constant 0 : i32
    return %c0_i32, %c0_i32_0 : i32, i32
  }
  func.func @transform_8(%arg0: i32) -> (i32, i32) {
    %c0_i32 = arith.constant 0 : i32
    %c0_i32_0 = arith.constant 0 : i32
    %c0_i32_1 = arith.constant 0 : i32
    return %c0_i32, %c0_i32_0 : i32, i32
  }
}

</mosaic_0001>

<bundles_post_ra>
// kernel: vgg16_remove1_ablation.1
= control target key start
LH: loop header
LB: loop body
LE: loop exit
PB: predicated region body
PF: predicated region fallthrough
CT: control target
= control target key end

     0   :  { %14 = vsyncpa [#allocation4], 0  ;;  %s902_s0 = inlined_call_operand.vmem [shape: f32[4,16,1], index: 0, kind: input, shape index: {}]   ;;  %s903_s1 = inlined_call_operand.vmem [shape: bf16[4,16,32], index: 1, kind: input, shape index: {}]   ;;  %s904_s2 = inlined_call_operand.vmem [shape: f32[1,32], index: 2, kind: input, shape index: {}]   ;;  %s905_s3 = inlined_call_operand.vmem [shape: bf16[32,32], index: 3, kind: input, shape index: {}]   ;;  %s906_s4 = inlined_call_operand.vmem [shape: f32[1,32], index: 4, kind: input, shape index: {}]   ;;  %s907_s5 = inlined_call_operand.vmem [shape: bf16[32,128], index: 5, kind: input, shape index: {}]   ;;  %s908_s6 = inlined_call_operand.vmem [shape: f32[1,128], index: 6, kind: input, shape index: {}]   ;;  %s909_s7 = inlined_call_operand.hbm [shape: f32[16,32], index: 7, kind: output, shape index: {0}]   ;;  %s910_s8 = inlined_call_operand.hbm [shape: f32[16,128], index: 8, kind: output, shape index: {1}]  }
   0x1   :  { %15 = vsyncpa [#allocation6], 0  ;;  %s805_s27 = smov 0  }
   0x2 LB: > { %s811_s28 = sadd.s32 4294967295, %s750_s27   ;;  %p601_p0 = scmp.ge.s32.totalorder %s750_s27, 1  ;;  %s750_s27 = sphi %s805_s27, %s21_s27  }
   0x3   : > { %p267_p1 = scmp.lt.s32.totalorder %s750_s27, 5 }
   0x5   : > { %p268_p2 = pnand %p601_p0, %p267_p1 }
   0x6   : > { %p301_p3 = scmp.lt.s32.totalorder (!%p268_p2), %s811_s28, 3  ;;  %p606_p4 = scmp.ne.s32.totalorder (!%p268_p2), %s811_s28, 0 }
   0x7   : > { %271 = sbr.rel (%p268_p2) target bundleno = 679 (0x2a7), region = 48 }
   0xe   : > { %s302_s29 = scalar_select %p301_p3, %s811_s28, 3 }
   0xf   : > { %315 = sbr.rel (%p606_p4) target bundleno = 22 (0x16), region = 52  ;;  %vm316_vm0 = vcmask (!%p606_p4), 261120   ;;  %v752_v0 = vmov (!%p606_p4), 0.0  }
  0x10   : > { %s623_s30 = sshll.u32 %s302_s29, 4  ;;  %s624_s9 = sshll.u32 %s302_s29, 3  ;;  %317 = vst.msk [vmem:[#allocation2] sm:$0xff] (!%p606_p4), %vm316_vm0, %v752_v0  ;;  %318 = vst.msk [vmem:[#allocation2 + $0x8] sm:$0xff] (!%p606_p4), %vm316_vm0, %v752_v0 }
  0x11   : > { %s305_s12 = scalar_lea.vmem %s902_s0, %s623_s30  ;;  %s310_s15 = scalar_lea.vmem %s903_s1, %s624_s9 }
  0x16 PF: > { %v321_v1 = vld [vmem:[%s305_s12] sm:$0xff]  ;;  %v753_v2 = vmov 0   ;;  %v322_v3 = vld [vmem:[%s305_s12 + $0x8] sm:$0xff]  ;;  %vm341_vm1 = vcmask 261120   ;;  %p607_p5 = scmp.ne.s32.totalorder %s811_s28, 3 }
  0x17   : > { %679 = vset.pattern.permute.xlu0 %v753_v2  ;;  %v626_v4 = vld [vmem:[%s310_s15] sm:$0xff]   ;;  %v320_v12 = vld [vmem:[#allocation2 + $0x8] sm:$0xff]  ;;  %v754_v16 = vmov (!%p607_p5), 0.0   ;;  %vm755_vm2 = vmmov (!%p607_p5), 0  }
  0x18   : > { %329 = vperm.xlu0 %679, %v321_v1   ;;  %v627_v5 = vunpack.c.l.bf16 %v626_v4  ;;  %v319_v7 = vld [vmem:[#allocation2] sm:$0xff]  ;;  %v628_v9 = vunpack.c.h.bf16 %v626_v4  ;;  %635 = vmatprep.subr.bf16.mxu0 (!%p607_p5), %v754_v16  ;;  %v681_v17 = vld [vmem:[%s905_s3 + $0x8] sm:$0xff] (!%p607_p5)  }
  0x19   : > { %v680_v15 = vld [vmem:[%s905_s3] sm:$0xff] (!%p607_p5)   ;;  %643 = vmatprep.subr.bf16.mxu1 (!%p607_p5), %v754_v16  ;;  %639 = vmatprep.mubr.msk.bf16.mxu0 (!%p607_p5), %vm755_vm2, %v754_v16  ;;  %v683_v38 = vld [vmem:[%s907_s5 + $0x8] sm:$0xff] (!%p607_p5)  }
  0x1a   : > { %636 = vmatpush3.bf16.msra.mxu0 (!%p607_p5), %v680_v15  ;;  %647 = vmatprep.mubr.msk.bf16.mxu1 (!%p607_p5), %vm755_vm2, %v754_v16  ;;  %v608_v29 = vld [vmem:[%s904_s2] ss:$0 sm:$0xff] (!%p607_p5) }
  0x1b   : > { %637 = vmatprep.subr.bf16.mxu0 (!%p607_p5), %v754_v16  ;;  %v682_v37 = vld [vmem:[%s907_s5] sm:$0xff] (!%p607_p5)  }
  0x1c   : > { %334 = vperm.xlu0 %679, %v322_v3   ;;  %644 = vmatpush3.bf16.msra.mxu1 (!%p607_p5), %v682_v37  ;;  %v609_v39 = vld [vmem:[%s906_s4] ss:$0 sm:$0xff] (!%p607_p5) }
  0x1d   : > { %645 = vmatprep.subr.bf16.mxu1 (!%p607_p5), %v754_v16  ;;  %v613_v49 = vld [vmem:[%s908_s6] ss:$0 sm:$0xff] (!%p607_p5) }
  0x1e   : > { %638 = vmatpush3.bf16.msra.mxu0 (!%p607_p5), %v681_v17 }
  0x20   : > { %646 = vmatpush3.bf16.msra.mxu1 (!%p607_p5), %v683_v38 }
  0x97   : > { %v330_v6 = vpop.permute.xlu0 %329 }
  0x98   : > { %v337_v8 = vmul.f32 %v627_v5, %v330_v6 }
  0x9a   : > { %v339_v10 = vadd.f32 %v337_v8, %v319_v7  ;;  %347 = sbr.rel (%p607_p5) target bundleno = 628 (0x274), region = 56 }
  0x9b   : > { %v335_v11 = vpop.permute.xlu0 %334 }
  0x9c   : > { %342 = vst.msk [vmem:[#allocation2] sm:$0xff] %vm341_vm1, %v339_v10  ;;  %v338_v13 = vmul.f32 %v628_v9, %v335_v11 }
  0x9e   : > { %v340_v14 = vadd.f32 %v338_v13, %v320_v12 }
  0xa0   : > { %343 = vst.msk [vmem:[#allocation2 + $0x8] sm:$0xff] %vm341_vm1, %v340_v14 }
  0xa3   : > { %v348_v18 = vld [vmem:[#allocation2] sm:$0xff] }
  0xa4   : > { %v350_v20 = vsel %vm341_vm1, %v348_v18, 0.0 }
  0xa7   : > { %v349_v19 = vld [vmem:[#allocation2 + $0x8] sm:$0xff] }
  0xa8   : > { %v351_v21 = vsel %vm341_vm1, %v349_v19, 0.0 }
  0xa9   : > { %v352_v22 = vadd.f32 %v351_v21, %v350_v20 }
  0xab   : > { %v353_v23 = vrot.slane %v352_v22, 4 }
  0xad   : > { %v354_v24 = vadd.f32 %v353_v23, %v352_v22 }
  0xaf   : > { %v355_v25 = vrot.slane %v354_v24, 2 }
  0xb1   : > { %v356_v26 = vadd.f32 %v355_v25, %v354_v24 }
  0xb3   : > { %v357_v27 = vrot.slane %v356_v26, 1 }
  0xb5   : > { %v358_v28 = vadd.f32 %v357_v27, %v356_v26 }
  0xb7   : > { %v359_v30 = vsub.f32 %v358_v28, %v348_v18  ;;  %v360_v31 = vsub.f32 %v358_v28, %v349_v19 }
  0xb9   : > { %v368_v32 = vadd.f32 %v608_v29, %v359_v30  ;;  %v369_v33 = vadd.f32 %v608_v29, %v360_v31 }
  0xbb   : > { %v370_v34 = vmax.f32 %v368_v32, 0.0  ;;  %v371_v35 = vmax.f32 %v369_v33, 0.0 }
  0xbd   : > { %v372_v36 = vpack.c.bf16 %v371_v35, %v370_v34 }
  0xbf   : > { %640 = vmatmul.mubr.msk.bf16.vlgmr.msra.gmra.mrb[0].mxu0 %vm341_vm1, %v372_v36 }
 0x192   : > { %v433_v40 = vpop.f32.mrb[0].mxu0 }
 0x193   : > { %v434_v41 = vadd.f32 %v609_v39, %v433_v40  ;;  %v641_v42 = vpop.f32.mrb[1].mxu0 }
 0x194   : > { %v436_v43 = vpop.f32.mrb[2].mxu0 }
 0x195   : > { %v440_v44 = vmax.f32 %v434_v41, 0.0  ;;  %v437_v45 = vadd.f32 %v609_v39, %v436_v43  ;;  %v642_v46 = vpop.f32.mrb[3].mxu0 }
 0x197   : > { %510 = vst.msk [vmem:[#allocation3] sm:$0xff] %vm341_vm1, %v440_v44  ;;  %v441_v47 = vmax.f32 %v437_v45, 0.0 }
 0x199   : > { %v442_v48 = vpack.c.bf16 %v441_v47, %v440_v44  ;;  %511 = vst.msk [vmem:[#allocation3 + $0x8] sm:$0xff] %vm341_vm1, %v441_v47 }
 0x19b   : > { %648 = vmatmul.mubr.msk.bf16.vlgmr.msra.gmra.mrb[0].mxu1 %vm341_vm1, %v442_v48 }
 0x26e   : > { %v503_v50 = vpop.f32.mrb[0].mxu1 }
 0x26f   : > { %v504_v51 = vadd.f32 %v613_v49, %v503_v50  ;;  %v649_v52 = vpop.f32.mrb[1].mxu1 }
 0x270   : > { %v506_v53 = vpop.f32.mrb[2].mxu1 }
 0x271   : > { %512 = vst [vmem:[#allocation5] sm:$0xff] %v504_v51  ;;  %v507_v54 = vadd.f32 %v613_v49, %v506_v53  ;;  %v650_v55 = vpop.f32.mrb[3].mxu1 }
 0x273   : > { %513 = vst [vmem:[#allocation5 + $0x8] sm:$0xff] %v507_v54 }
 0x274 PF: > { %p659_p6 = scmp.eq.s32.totalorder %s811_s28, 3  ;;  %s756_s10 = smov [#allocation3]  }
 0x275   : > { %s520_s11 = sshll.u32 %s756_s10, 4  ;;  %s521_s11 = int_to_ptr.vmem [resolvable:$true] %s520_s11 }
 0x276   : > { %s684_s12 = scalar_lea.vmem %s521_s11, 256  ;;  %p691_p10 = scmp.lt.s32.totalorder %s521_s11, %s521_s11 }
 0x277   : > { %p685_p7 = scmp.ne.s32.totalorder %s521_s11, %s684_s12  ;;  %p692_p11 = scmp.lt.s32.totalorder %s684_s12, %s684_s12 }
 0x279   : > { %p686_p8 = pnand %p685_p7, %p659_p6  ;;  %p693_p12 = por %p692_p11, %p691_p10 }
 0x27b   : > { %p687_p9 = pneg %p686_p8 }
 0x27d   : > { %p694_p13 = pnand %p693_p12, %p687_p9 }
 0x27f   : > { %697 = shalt.err (!%p694_p13)
}
 0x280   : > { %s698_s15 = scalar_lea.hbm %s909_s7, 256 }
 0x281   : > { %p699_p0 = scmp.ne.s32.totalorder %s909_s7, %s698_s15  ;;  %p704_p3 = scmp.lt.u32.totalorder %s698_s15, %s909_s7 }
 0x283   : > { %p700_p1 = pnand %p699_p0, %p659_p6 }
 0x285   : > { %p701_p2 = pneg %p700_p1 }
 0x287   : > { %p706_p4 = pnand %p704_p3, %p701_p2 }
 0x289   : > { %709 = shalt.err (!%p706_p4)
}
 0x28a   : > { %s757_s20 = smov 128   ;;  %s758_s21 = smov 8  }
 0x28b   : > { %652 = dma.vmem_to_hbm [thread:$0]  (%p659_p6), %s521_s11, 256, %s909_s7, [#allocation4], %s757_s20, %s757_s20, %s758_s21  }
 0x28c   : > { %s759_s24 = smov [#allocation5]  }
 0x28d   : > { %s533_s25 = sshll.u32 %s759_s24, 4  ;;  %s534_s25 = int_to_ptr.vmem [resolvable:$true] %s533_s25 }
 0x28e   : > { %s710_s26 = scalar_lea.vmem %s534_s25, 256  ;;  %p717_p9 = scmp.lt.s32.totalorder %s534_s25, %s534_s25 }
 0x28f   : > { %p711_p5 = scmp.ne.s32.totalorder %s534_s25, %s710_s26  ;;  %p718_p10 = scmp.lt.s32.totalorder %s710_s26, %s710_s26 }
 0x291   : > { %p712_p7 = pnand %p711_p5, %p659_p6  ;;  %p719_p11 = por %p718_p10, %p717_p9 }
 0x293   : > { %p713_p8 = pneg %p712_p7 }
 0x295   : > { %p720_p12 = pnand %p719_p11, %p713_p8 }
 0x297   : > { %723 = shalt.err (!%p720_p12)
}
 0x298   : > { %s724_s9 = scalar_lea.hbm %s910_s8, 256 }
 0x299   : > { %p725_p13 = scmp.ne.s32.totalorder %s910_s8, %s724_s9  ;;  %p730_p2 = scmp.lt.u32.totalorder %s724_s9, %s910_s8 }
 0x29b   : > { %p726_p0 = pnand %p725_p13, %p659_p6 }
 0x29d   : > { %p727_p1 = pneg %p726_p0 }
 0x29f   : > { %p732_p3 = pnand %p730_p2, %p727_p1 }
 0x2a1   : > { %735 = shalt.err (!%p732_p3)
}
 0x2a2   : > { %654 = dma.vmem_to_hbm [thread:$0]  (%p659_p6), %s534_s25, 256, %s910_s8, [#allocation6], %s757_s20, %s757_s20, %s758_s21  }
 0x2a3   : > { %741 = dma.done.wait (%p659_p6), [#allocation4], 256  }
 0x2a4   : > { %743 = vsyncadd (%p659_p6), [#allocation4], 4294967040 }
 0x2a5   : > { %745 = dma.done.wait (%p659_p6), [#allocation6], 256  }
 0x2a6   : > { %747 = vsyncadd (%p659_p6), [#allocation6], 4294967040 }
 0x2a7 PF: > { %s21_s27 = sadd.s32 1, %s750_s27  }
 0x2a8   : > { %p18_p4 = scmp.ge.s32.totalorder %s21_s27, 6  }
 0x2aa   :  { %20 = sbr.rel (!%p18_p4) target bundleno = 2 (0x2), region = 94 }
 0x2b1   :  { %553 = vsyncpa [#allocation4], 1 }
 0x2b2   :  { %555 = vsyncpa [#allocation4 + $0x1], 1 }
 0x2b3   :  { %556 = vsyncpa [#allocation6], 1 }

</bundles_post_ra>
